<compile_context>
chip_gen: v5e
topology: v5e:2x2
jax: 0.10.0
libtpu: 0.0.40
codegen_flags: <defaults>
</compile_context>

<pallas_src>
import jax
import jax.numpy as jnp
from jax import lax
from jax.experimental import pallas as pl
from jax.experimental.pallas import tpu as pltpu


# ----------------------------------------------------------------------------
# Fused SwiGLU-style MLP kernel
#   grid = (token tiles [parallel], intermediate tiles [arbitrary/reduction])
# ----------------------------------------------------------------------------
def _yuan_mlp_kernel(x_ref, wu_ref, wg_ref, wd_ref, o_ref, acc_ref):
    """One (token-tile, intermediate-tile) grid step.

    x_ref  : [tT, H]     input activations
    wu_ref : [H, tI]     up_proj weight slice    (pre-transposed)
    wg_ref : [H, tI]     gate_proj weight slice  (pre-transposed)
    wd_ref : [tI, H]     down_proj weight slice  (pre-transposed)
    o_ref  : [tT, H]     output tile (written on last intermediate step)
    acc_ref: [tT, H] f32 accumulator over the intermediate dimension
    """
    j = pl.program_id(1)

    @pl.when(j == 0)
    def _init():
        acc_ref[...] = jnp.zeros_like(acc_ref)

    x = x_ref[...]
    up = jnp.dot(x, wu_ref[...], preferred_element_type=jnp.float32)    # [tT, tI]
    gate = jnp.dot(x, wg_ref[...], preferred_element_type=jnp.float32)  # [tT, tI]
    # x2 * silu(x1): silu on the up projection, element-wise math in f32.
    act = gate * (up * lax.logistic(up))                                 # [tT, tI]
    acc_ref[...] += jnp.dot(act.astype(wd_ref.dtype), wd_ref[...],
                            preferred_element_type=jnp.float32)          # [tT, H]

    @pl.when(j == pl.num_programs(1) - 1)
    def _finalize():
        o_ref[...] = acc_ref[...].astype(o_ref.dtype)


def _pick_intermediate_tile(I):
    for c in (512, 256, 128):          # multiples of 128 lanes
        if I >= c and I % c == 0:
            return c
    return I                            # small I: use the full dimension


def prepare_yuan_mlp_weights(up_w, gate_w, down_w, dtype=None):
    """One-time layout plumbing (do this at weight-load time, not per forward).

    Inputs are in torch nn.Linear layout [out_features, in_features]:
      up_w, gate_w: [I, H];  down_w: [H, I]
    Returns pre-transposed (w_up_t [H,I], w_gate_t [H,I], w_down_t [I,H]),
    optionally cast to `dtype` (e.g. jnp.bfloat16 on v6e/v7x).
    """
    w_up_t = jnp.asarray(up_w).T
    w_gate_t = jnp.asarray(gate_w).T
    w_down_t = jnp.asarray(down_w).T
    if dtype is not None:
        w_up_t = w_up_t.astype(dtype)
        w_gate_t = w_gate_t.astype(dtype)
        w_down_t = w_down_t.astype(dtype)
    return w_up_t, w_gate_t, w_down_t


def yuan_mlp_forward(x, w_up_t, w_gate_t, w_down_t, *,
                     token_tile=256, vmem_limit_bytes=None):
    """x: [T, H];  w_up_t/w_gate_t: [H, I];  w_down_t: [I, H] (pre-transposed)."""
    T, H = x.shape
    I = w_up_t.shape[1]
    out_dtype = x.dtype

    # --- token tiling (pad T so the grid divides evenly) ---------------------
    tT = min(token_tile, T)
    T_pad = ((T + tT - 1) // tT) * tT
    if T_pad != T:
        x = jnp.pad(x, ((0, T_pad - T), (0, 0)))

    # --- intermediate-dim tiling (reduction axis, kept last) -----------------
    tI = _pick_intermediate_tile(I)
    grid = (T_pad // tT, I // tI)

    # --- VMEM budget: raise the scoped limit only when needed ----------------
    if vmem_limit_bytes is None:
        x_isz = jnp.dtype(x.dtype).itemsize
        w_isz = jnp.dtype(w_up_t.dtype).itemsize
        est = (2 * (tT * H * x_isz              # x tiles (double-buffered)
                    + 2 * H * tI * w_isz        # up + gate weight tiles
                    + tI * H * w_isz            # down weight tile
                    + tT * H * x_isz)           # out tiles
               + tT * H * 4)                    # f32 accumulator
        if est > (16 << 20):
            vmem_limit_bytes = min(int(est * 1.5), 96 << 20)

    cp_kwargs = dict(dimension_semantics=("parallel", "arbitrary"))
    if vmem_limit_bytes is not None:
        cp_kwargs["vmem_limit_bytes"] = int(vmem_limit_bytes)

    out = pl.pallas_call(
        _yuan_mlp_kernel,
        out_shape=jax.ShapeDtypeStruct((T_pad, H), out_dtype),
        grid=grid,
        in_specs=[
            pl.BlockSpec((tT, H), lambda i, j: (i, 0)),   # x
            pl.BlockSpec((H, tI), lambda i, j: (0, j)),   # up weight
            pl.BlockSpec((H, tI), lambda i, j: (0, j)),   # gate weight
            pl.BlockSpec((tI, H), lambda i, j: (j, 0)),   # down weight
        ],
        out_specs=pl.BlockSpec((tT, H), lambda i, j: (i, 0)),
        scratch_shapes=[pltpu.VMEM((tT, H), jnp.float32)],
        compiler_params=pltpu.CompilerParams(**cp_kwargs),
    )(x, w_up_t, w_gate_t, w_down_t)

    return out[:T] if T_pad != T else out


# ----------------------------------------------------------------------------
# Pure-JAX reference (torch nn.Linear layout weights)
# ----------------------------------------------------------------------------
def reference_forward(x, up_w, gate_w, down_w):
    hp = lax.Precision.HIGHEST
    x1 = jnp.dot(x, up_w.T, precision=hp)        # up_proj(x)
    x3 = x1 * jax.nn.sigmoid(x1)                 # silu
    x2 = jnp.dot(x, gate_w.T, precision=hp)      # gate_proj(x)
    return jnp.dot(x2 * x3, down_w.T, precision=hp)   # down_proj


if __name__ == "__main__":
    T, H, I = 8, 32, 64   # tokens, hidden_size, intermediate_size

    key = jax.random.PRNGKey(0)
    kx, ku, kg, kd = jax.random.split(key, 4)
    x = jax.random.normal(kx, (T, H), dtype=jnp.float32)
    up_w = jax.random.normal(ku, (I, H), dtype=jnp.float32) * 0.05     # [out, in]
    gate_w = jax.random.normal(kg, (I, H), dtype=jnp.float32) * 0.05   # [out, in]
    down_w = jax.random.normal(kd, (H, I), dtype=jnp.float32) * 0.05   # [out, in]

    ref = reference_forward(x, up_w, gate_w, down_w)

    # --- f32 path -------------------------------------------------------------
    w_up_t, w_gate_t, w_down_t = prepare_yuan_mlp_weights(up_w, gate_w, down_w)
    out = yuan_mlp_forward(x, w_up_t, w_gate_t, w_down_t)
    out = jax.block_until_ready(out)
    assert out.shape == (T, H)
    assert jnp.allclose(out, ref, rtol=2e-3, atol=2e-3), "f32 mismatch vs reference"

    # --- bf16 storage path (weights/activations bf16, f32 accumulation) ------
    w_up_b, w_gate_b, w_down_b = prepare_yuan_mlp_weights(
        up_w, gate_w, down_w, dtype=jnp.bfloat16)
    out_b = yuan_mlp_forward(x.astype(jnp.bfloat16), w_up_b, w_gate_b, w_down_b)
    out_b = jax.block_until_ready(out_b)
    assert out_b.shape == (T, H)
    assert jnp.allclose(out_b.astype(jnp.float32), ref, rtol=1e-1, atol=5e-2), \
        "bf16 mismatch vs reference"

    print("KERNEL_OK")
</pallas_src>

<mosaic_0001>
module attributes {stable_mosaic.version = 11 : i64} {
  func.func @_yuan_mlp_kernel(%arg0: i32, %arg1: i32, %arg2: memref<8x32xf32, #tpu.memory_space<vmem>>, %arg3: memref<32x64xf32, #tpu.memory_space<vmem>>, %arg4: memref<32x64xf32, #tpu.memory_space<vmem>>, %arg5: memref<64x32xf32, #tpu.memory_space<vmem>>, %arg6: memref<8x32xf32, #tpu.memory_space<vmem>>, %arg7: memref<8x32xf32, #tpu.memory_space<vmem>>) attributes {dimension_semantics = [#tpu.dimension_semantics<parallel>, #tpu.dimension_semantics<arbitrary>], iteration_bounds = array<i64: 1, 1>, scalar_prefetch = 0 : i64, scratch_operands = 1 : i64, tpu.core_type = #tpu.core_type<tc>, window_params = [{transform_indices = @transform_0, window_bounds = array<i64: 8, 32>}, {transform_indices = @transform_1, window_bounds = array<i64: 32, 64>}, {transform_indices = @transform_2, window_bounds = array<i64: 32, 64>}, {transform_indices = @transform_3, window_bounds = array<i64: 64, 32>}, {transform_indices = @transform_4, window_bounds = array<i64: 8, 32>}]} {
    %c0_i32 = arith.constant 0 : i32
    %0 = arith.cmpi eq, %arg1, %c0_i32 : i32
    %1 = arith.extui %0 : i1 to i32
    %c0_i32_0 = arith.constant 0 : i32
    %2 = arith.cmpi ne, %1, %c0_i32_0 : i32
    scf.if %2 {
      %cst_17 = arith.constant 0.000000e+00 : f32
      %23 = vector.broadcast %cst_17 : f32 to vector<8x32xf32>
      %c0_18 = arith.constant 0 : index
      %c0_19 = arith.constant 0 : index
      %24 = vector.load %arg7[%c0_18, %c0_19] : memref<8x32xf32, #tpu.memory_space<vmem>>, vector<8x32xf32>
      tpu.vector_store %arg7[%c0_18, %c0_19], %23 {strides = array<i32>} : memref<8x32xf32, #tpu.memory_space<vmem>>, vector<8x32xf32>,
    } else {
    }
    %c0 = arith.constant 0 : index
    %c0_1 = arith.constant 0 : index
    %3 = vector.load %arg2[%c0, %c0_1] : memref<8x32xf32, #tpu.memory_space<vmem>>, vector<8x32xf32>
    %c0_2 = arith.constant 0 : index
    %c0_3 = arith.constant 0 : index
    %4 = vector.load %arg3[%c0_2, %c0_3] : memref<32x64xf32, #tpu.memory_space<vmem>>, vector<32x64xf32>
    %cst = arith.constant dense<0.000000e+00> : vector<8x64xf32>
    %5 = tpu.matmul %3, %4, %cst {dimension_numbers = #tpu.dot_dimension_numbers<[1], [0], [0], [1], [0, 0, 1, 1], [], []>} : vector<8x32xf32>, vector<32x64xf32>, vector<8x64xf32> -> vector<8x64xf32>
    %c0_4 = arith.constant 0 : index
    %c0_5 = arith.constant 0 : index
    %6 = vector.load %arg4[%c0_4, %c0_5] : memref<32x64xf32, #tpu.memory_space<vmem>>, vector<32x64xf32>
    %cst_6 = arith.constant dense<0.000000e+00> : vector<8x64xf32>
    %7 = tpu.matmul %3, %6, %cst_6 {dimension_numbers = #tpu.dot_dimension_numbers<[1], [0], [0], [1], [0, 0, 1, 1], [], []>} : vector<8x32xf32>, vector<32x64xf32>, vector<8x64xf32> -> vector<8x64xf32>
    %8 = arith.negf %5 : vector<8x64xf32>
    %9 = math.exp %8 : vector<8x64xf32>
    %cst_7 = arith.constant 1.000000e+00 : f32
    %10 = vector.broadcast %cst_7 : f32 to vector<8x64xf32>
    %11 = arith.addf %10, %9 : vector<8x64xf32>
    %12 = arith.divf %10, %11 : vector<8x64xf32>
    %13 = arith.mulf %5, %12 : vector<8x64xf32>
    %14 = arith.mulf %7, %13 : vector<8x64xf32>
    %c0_8 = arith.constant 0 : index
    %c0_9 = arith.constant 0 : index
    %15 = vector.load %arg7[%c0_8, %c0_9] : memref<8x32xf32, #tpu.memory_space<vmem>>, vector<8x32xf32>
    %c0_10 = arith.constant 0 : index
    %c0_11 = arith.constant 0 : index
    %16 = vector.load %arg5[%c0_10, %c0_11] : memref<64x32xf32, #tpu.memory_space<vmem>>, vector<64x32xf32>
    %cst_12 = arith.constant dense<0.000000e+00> : vector<8x32xf32>
    %17 = tpu.matmul %14, %16, %cst_12 {dimension_numbers = #tpu.dot_dimension_numbers<[1], [0], [0], [1], [0, 0, 1, 1], [], []>} : vector<8x64xf32>, vector<64x32xf32>, vector<8x32xf32> -> vector<8x32xf32>
    %18 = arith.addf %15, %17 : vector<8x32xf32>
    %c0_13 = arith.constant 0 : index
    %c0_14 = arith.constant 0 : index
    %19 = vector.load %arg7[%c0_13, %c0_14] : memref<8x32xf32, #tpu.memory_space<vmem>>, vector<8x32xf32>
    tpu.vector_store %arg7[%c0_13, %c0_14], %18 {strides = array<i32>} : memref<8x32xf32, #tpu.memory_space<vmem>>, vector<8x32xf32>,
    %c0_i32_15 = arith.constant 0 : i32
    %20 = arith.cmpi eq, %arg1, %c0_i32_15 : i32
    %21 = arith.extui %20 : i1 to i32
    %c0_i32_16 = arith.constant 0 : i32
    %22 = arith.cmpi ne, %21, %c0_i32_16 : i32
    scf.if %22 {
      %c0_17 = arith.constant 0 : index
      %c0_18 = arith.constant 0 : index
      %23 = vector.load %arg7[%c0_17, %c0_18] : memref<8x32xf32, #tpu.memory_space<vmem>>, vector<8x32xf32>
      %c0_19 = arith.constant 0 : index
      %c0_20 = arith.constant 0 : index
      %24 = vector.load %arg6[%c0_19, %c0_20] : memref<8x32xf32, #tpu.memory_space<vmem>>, vector<8x32xf32>
      tpu.vector_store %arg6[%c0_19, %c0_20], %23 {strides = array<i32>} : memref<8x32xf32, #tpu.memory_space<vmem>>, vector<8x32xf32>,
    } else {
    }
    return
  }
  func.func @transform_0(%arg0: i32, %arg1: i32) -> (i32, i32) {
    %c0_i32 = arith.constant 0 : i32
    %c0_i32_0 = arith.constant 0 : i32
    return %arg0, %c0_i32 : i32, i32
  }
  func.func @transform_1(%arg0: i32, %arg1: i32) -> (i32, i32) {
    %c0_i32 = arith.constant 0 : i32
    %c0_i32_0 = arith.constant 0 : i32
    return %c0_i32, %arg1 : i32, i32
  }
  func.func @transform_2(%arg0: i32, %arg1: i32) -> (i32, i32) {
    %c0_i32 = arith.constant 0 : i32
    %c0_i32_0 = arith.constant 0 : i32
    return %c0_i32, %arg1 : i32, i32
  }
  func.func @transform_3(%arg0: i32, %arg1: i32) -> (i32, i32) {
    %c0_i32 = arith.constant 0 : i32
    %c0_i32_0 = arith.constant 0 : i32
    return %arg1, %c0_i32 : i32, i32
  }
  func.func @transform_4(%arg0: i32, %arg1: i32) -> (i32, i32) {
    %c0_i32 = arith.constant 0 : i32
    %c0_i32_0 = arith.constant 0 : i32
    return %arg0, %c0_i32 : i32, i32
  }
}

</mosaic_0001>

<bundles_post_ra>
// kernel: tpu_custom_call.1
= control target key start
LH: loop header
LB: loop body
LE: loop exit
PB: predicated region body
PF: predicated region fallthrough
CT: control target
= control target key end

     0   :  { %s276_s0 = inlined_call_operand.vmem [shape: f32[8,32], index: 0, kind: input, shape index: {}]   ;;  %s277_s1 = inlined_call_operand.vmem [shape: f32[32,64], index: 1, kind: input, shape index: {}]   ;;  %s278_s2 = inlined_call_operand.vmem [shape: f32[32,64], index: 2, kind: input, shape index: {}]   ;;  %s279_s3 = inlined_call_operand.vmem [shape: f32[64,32], index: 3, kind: input, shape index: {}]   ;;  %s280_s4 = inlined_call_operand.hbm [shape: f32[8,32], index: 4, kind: output, shape index: {}]  }
   0x1   :  { %v28_v0 = vld [vmem:[%s277_s1 + $0x18] sm:$0xff]  ;;  %v27_v1 = vld [vmem:[%s277_s1 + $0x10] sm:$0xff]  ;;  %v26_v3 = vld [vmem:[%s277_s1 + $0x8] sm:$0xff] }
   0x2   :  { %45 = vmatpush.msra.mxu0 %v28_v0  ;;  %v56_v2 = vld [vmem:[%s278_s2 + $0x18] sm:$0xff]  ;;  %v55_v4 = vld [vmem:[%s278_s2 + $0x10] sm:$0xff]  ;;  %v54_v5 = vld [vmem:[%s278_s2 + $0x8] sm:$0xff] }
   0x3   :  { %69 = vmatpush.msra.mxu1 %v56_v2 }
   0x4   :  { %46 = vmatpush.msra.mxu0 %v27_v1 }
   0x5   :  { %9 = vsyncpa [#allocation4], 0  ;;  %v25_v6 = vld [vmem:[%s277_s1] sm:$0xff]  ;;  %70 = vmatpush.msra.mxu1 %v55_v4  ;;  %vm22_vm0 = vcmask 261120   ;;  %v106_v9 = vld [vmem:[%s279_s3 + $0x38] sm:$0xff]  ;;  %v190_v19 = vmov 0.0  }
   0x6   :  { %47 = vmatpush.msra.mxu0 %v26_v3  ;;  %v24_v7 = vld [vmem:[%s276_s0] sm:$0xff]  ;;  %119 = vmatpush.msra.mxu2 %v106_v9  ;;  %v105_v10 = vld [vmem:[%s279_s3 + $0x30] sm:$0xff]  ;;  %v104_v11 = vld [vmem:[%s279_s3 + $0x28] sm:$0xff]  ;;  %23 = vst.msk [vmem:[#allocation2] sm:$0xff] %vm22_vm0, %v190_v19  ;;  %vm107_vm5 = vcmask 523264   ;;  %s145_s23 = sshll.u32 %s280_s4, 4  ;;  %s146_s23 = int_to_ptr.hbm [resolvable:$true] %s145_s23 }
   0x7   :  { %v53_v8 = vld [vmem:[%s278_s2] sm:$0xff]  ;;  %71 = vmatpush.msra.mxu1 %v54_v5  ;;  %v102_v13 = vld [vmem:[%s279_s3 + $0x18] sm:$0xff]  ;;  %v101_v14 = vld [vmem:[%s279_s3 + $0x10] sm:$0xff] }
   0x8   :  { %48 = vmatpush.msra.mxu0 %v25_v6  ;;  %120 = vmatpush.msra.mxu2 %v105_v10  ;;  %v103_v12 = vld [vmem:[%s279_s3 + $0x20] sm:$0xff]  ;;  %v100_v15 = vld [vmem:[%s279_s3 + $0x8] sm:$0xff] }
   0x9   :  { %154 = vmatmul.msk.f32.vlgmr.msra.gmra.mxu0 %vm22_vm0, %v24_v7  ;;  %72 = vmatpush.msra.mxu1 %v53_v8  ;;  %v99_v16 = vld [vmem:[%s279_s3] sm:$0xff]  ;;  %s191_s3 = smov [#allocation3]  }
   0xa   :  { %155 = vmatmul.msk.f32.vlgmr.msra.gmra.mxu1 %vm22_vm0, %v24_v7  ;;  %121 = vmatpush.msra.mxu2 %v104_v11  ;;  %s143_s20 = sshll.u32 %s191_s3, 4  ;;  %s144_s20 = int_to_ptr.vmem [resolvable:$true] %s143_s20 }
   0xc   :  { %122 = vmatpush.msra.mxu2 %v103_v12 }
   0xd   :  { %v98_v35 = vld [vmem:[#allocation2] sm:$0xff] }
   0xe   :  { %123 = vmatpush.msra.mxu2 %v102_v13 }
  0x10   :  { %124 = vmatpush.msra.mxu2 %v101_v14 }
  0x12   :  { %125 = vmatpush.msra.mxu2 %v100_v15 }
  0x14   :  { %126 = vmatpush.msra.mxu2 %v99_v16 }
  0x86   :  { %v50_v17 = vpop.f32.mrf.mxu0 }
  0x87   :  { %v156_v18 = vmul.f32 -1.442695, %v50_v17  ;;  %v74_v32 = vpop.f32.mrf.mxu1 }
  0x89   :  { %160 = vpow2.f32 %v156_v18 }
  0x8f   :  { %v161_v20 = vpop.eup %160 }
  0x90   :  { %v80_v21 = vadd.f32 1.0, %v161_v20 }
  0x92   :  { %162 = vrcp.f32 %v80_v21  ;;  %v92_v25 = vand.u32 2147483648, %v80_v21  ;;  %v90_v27 = vand.u32 2147483647, %v80_v21  ;;  %vm86_vm2 = vweird.f32 %v80_v21 }
  0x94   :  { %v93_v29 = vor.u32 1.1754944e-38, %v92_v25  ;;  %vm91_vm4 = vcmp.eq.f32.partialorder %v90_v27, 8.507059e+37 }
  0x98   :  { %v163_v22 = vpop.eup %162 }
  0x99   :  { %v82_v23 = vmul.f32 %v163_v22, %v80_v21  ;;  %vm87_vm1 = vweird.f32 %v163_v22 }
  0x9a   :  { %vm88_vm3 = vmor %vm86_vm2, %vm87_vm1 }
  0x9b   :  { %v83_v24 = vsub.f32 1.0, %v82_v23 }
  0x9d   :  { %v84_v26 = vmul.f32 %v163_v22, %v83_v24 }
  0x9f   :  { %v85_v28 = vadd.f32 %v163_v22, %v84_v26 }
  0xa1   :  { %v89_v30 = vsel %vm88_vm3, %v163_v22, %v85_v28 }
  0xa2   :  { %v94_v31 = vsel %vm91_vm4, %v93_v29, %v89_v30 }
  0xa3   :  { %v96_v33 = vmul.f32 %v94_v31, %v50_v17 }
  0xa5   :  { %v97_v34 = vmul.f32 %v96_v33, %v74_v32 }
  0xa7   :  { %157 = vmatmul.msk.f32.vlgmr.msra.gmra.mxu2 %vm107_vm5, %v97_v34 }
 0x12a   :  { %v128_v36 = vpop.f32.mrf.mxu2 }
 0x12b   :  { %v131_v37 = vadd.f32 %v128_v36, %v98_v35 }
 0x12d   :  { %132 = vst.msk [vmem:[#allocation2] sm:$0xff] %vm22_vm0, %v131_v37 }
 0x134   :  { %v136_v38 = vld [vmem:[#allocation2] sm:$0xff] }
 0x135   :  { %137 = vst.msk [vmem:[#allocation3] sm:$0xff] %vm22_vm0, %v136_v38 }
 0x136   :  { %148 = dma.vmem_to_hbm [thread:$0]  %s144_s20, 128, %s146_s23, [#allocation4]  }
 0x137   :  { %188 = dma.done.wait [#allocation4], 128  }
 0x138   :  { %189 = vsyncadd [#allocation4], 4294967168 }
 0x139   :  { %153 = vsyncpa [#allocation4], 1 }

</bundles_post_ra>
